<compile_context>
chip_gen: v7x
topology: tpu7x:2x2x1
jax: 0.10.0
libtpu: 0.0.40
codegen_flags: <defaults>
</compile_context>

<pallas_src>
import functools

import jax
import jax.numpy as jnp
from jax import lax
from jax.experimental import pallas as pl
from jax.experimental.pallas import tpu as pltpu

LANE = 128
SUBLANE = 8
MAX_TILE_R = 2048  # 2048x128 f32 = 1 MiB/tile/input; 4 MiB with double-buffered pair.


def _pow_gamma(x, gamma):
    if float(gamma).is_integer():
        return lax.integer_pow(x, int(gamma))  # gamma=2 -> x*x on the VPU
    # Non-integer gamma: clamp base to avoid NaN from tiny negative rounding.
    return jnp.power(jnp.maximum(x, jnp.float32(0.0)), jnp.float32(gamma))


def _focal_loss_kernel(p_ref, t_ref, o_ref, *, alpha, gamma):
    p = p_ref[...].astype(jnp.float32)
    t = t_ref[...].astype(jnp.float32)

    # BCELoss(reduction='none') with PyTorch's log clamp at -100.
    log_p = jnp.maximum(jnp.log(p), jnp.float32(-100.0))
    log_1mp = jnp.maximum(jnp.log(1.0 - p), jnp.float32(-100.0))
    bce = -(t * log_p + (1.0 - t) * log_1mp)

    pt = jnp.exp(-bce)
    focal = jnp.float32(alpha) * _pow_gamma(1.0 - pt, gamma) * bce

    # Partial-sum this tile down to one (8, 128) vreg with plain vector adds;
    # the final cross-lane reduction happens once, in the wrapper.
    tile_r = focal.shape[0]
    partial = focal.reshape(tile_r // SUBLANE, SUBLANE, LANE).sum(axis=0)
    o_ref[...] = partial


def focal_loss(inputs, targets, alpha=1.0, gamma=2.0):
    """inputs, targets: same-shape arrays of probabilities in [0,1].

    Returns the scalar mean focal loss (PyTorch FocalLoss forward semantics).
    """
    n = inputs.size
    p = inputs.reshape(-1)
    t = targets.reshape(-1)

    # Pad flat length to a multiple of LANE, then rows to a multiple of the row
    # tile. Zero padding (p=0, t=0) yields bce=0 -> focal=0, so the sum is
    # unchanged; the mean divides by the original n.
    rows = pl.cdiv(n, LANE)
    tile_r = min(MAX_TILE_R, pl.cdiv(rows, 16) * 16)  # multiple of 16 (bf16-safe)
    rows_pad = pl.cdiv(rows, tile_r) * tile_r
    total_pad = rows_pad * LANE
    if total_pad != n:
        p = jnp.pad(p, (0, total_pad - n))
        t = jnp.pad(t, (0, total_pad - n))
    p2 = p.reshape(rows_pad, LANE)
    t2 = t.reshape(rows_pad, LANE)

    grid_r = rows_pad // tile_r

    kernel = functools.partial(
        _focal_loss_kernel, alpha=float(alpha), gamma=float(gamma)
    )

    partials = pl.pallas_call(
        kernel,
        out_shape=jax.ShapeDtypeStruct((grid_r * SUBLANE, LANE), jnp.float32),
        grid=(grid_r,),
        in_specs=[
            pl.BlockSpec((tile_r, LANE), lambda i: (i, 0)),
            pl.BlockSpec((tile_r, LANE), lambda i: (i, 0)),
        ],
        out_specs=pl.BlockSpec((SUBLANE, LANE), lambda i: (i, 0)),
        compiler_params=pltpu.CompilerParams(
            # Each step writes an independent output block -> fully parallel;
            # lets v7x shard the loop across both TensorCores.
            dimension_semantics=("parallel",),
        ),
    )(p2, t2)

    return jnp.sum(partials) / jnp.float32(n)


def _focal_loss_ref(inputs, targets, alpha=1.0, gamma=2.0):
    p = inputs.astype(jnp.float32)
    t = targets.astype(jnp.float32)
    log_p = jnp.maximum(jnp.log(p), -100.0)
    log_1mp = jnp.maximum(jnp.log(1.0 - p), -100.0)
    bce = -(t * log_p + (1.0 - t) * log_1mp)
    pt = jnp.exp(-bce)
    return jnp.mean(alpha * (1.0 - pt) ** gamma * bce)


if __name__ == "__main__":
    key = jax.random.PRNGKey(0)
    k1, k2 = jax.random.split(key)

    # NCHW-style inputs, consistent with a segmentation-style use of FocalLoss.
    x_logits = jax.random.normal(k1, (2, 4, 16, 16), dtype=jnp.float32)
    inputs = jax.nn.sigmoid(x_logits)  # probabilities in (0,1)
    targets = jax.random.bernoulli(k2, 0.5, (2, 4, 16, 16)).astype(jnp.float32)

    loss = focal_loss(inputs, targets, alpha=1.0, gamma=2.0)
    loss = jax.block_until_ready(loss)

    ref = _focal_loss_ref(inputs, targets, alpha=1.0, gamma=2.0)
    assert jnp.allclose(loss, ref, rtol=1e-5, atol=1e-6), (loss, ref)

    print("KERNEL_OK")
</pallas_src>

<mosaic_0001>
module attributes {stable_mosaic.version = 11 : i64} {
  func.func @_focal_loss_kernel(%arg0: i32, %arg1: memref<16x128xf32, #tpu.memory_space<vmem>>, %arg2: memref<16x128xf32, #tpu.memory_space<vmem>>, %arg3: memref<8x128xf32, #tpu.memory_space<vmem>>) attributes {dimension_semantics = [#tpu.dimension_semantics<parallel>], iteration_bounds = array<i64: 1>, scalar_prefetch = 0 : i64, scratch_operands = 0 : i64, tpu.core_type = #tpu.core_type<tc>, window_params = [{transform_indices = @transform_0, window_bounds = array<i64: 16, 128>}, {transform_indices = @transform_1, window_bounds = array<i64: 16, 128>}, {transform_indices = @transform_2, window_bounds = array<i64: 8, 128>}]} {
    %c0 = arith.constant 0 : index
    %c0_0 = arith.constant 0 : index
    %0 = vector.load %arg1[%c0, %c0_0] : memref<16x128xf32, #tpu.memory_space<vmem>>, vector<16x128xf32>
    %c0_1 = arith.constant 0 : index
    %c0_2 = arith.constant 0 : index
    %1 = vector.load %arg2[%c0_1, %c0_2] : memref<16x128xf32, #tpu.memory_space<vmem>>, vector<16x128xf32>
    %2 = math.log %0 : vector<16x128xf32>
    %cst = arith.constant -1.000000e+02 : f32
    %3 = vector.broadcast %cst : f32 to vector<16x128xf32>
    %4 = arith.maximumf %2, %3 : vector<16x128xf32>
    %cst_3 = arith.constant 1.000000e+00 : f32
    %5 = vector.broadcast %cst_3 : f32 to vector<16x128xf32>
    %6 = arith.subf %5, %0 : vector<16x128xf32>
    %7 = math.log %6 : vector<16x128xf32>
    %cst_4 = arith.constant -1.000000e+02 : f32
    %8 = vector.broadcast %cst_4 : f32 to vector<16x128xf32>
    %9 = arith.maximumf %7, %8 : vector<16x128xf32>
    %10 = arith.mulf %1, %4 : vector<16x128xf32>
    %cst_5 = arith.constant 1.000000e+00 : f32
    %11 = vector.broadcast %cst_5 : f32 to vector<16x128xf32>
    %12 = arith.subf %11, %1 : vector<16x128xf32>
    %13 = arith.mulf %12, %9 : vector<16x128xf32>
    %14 = arith.addf %10, %13 : vector<16x128xf32>
    %cst_6 = arith.constant 0.000000e+00 : f32
    %15 = vector.broadcast %cst_6 : f32 to vector<16x128xf32>
    %16 = arith.subf %15, %14 : vector<16x128xf32>
    %cst_7 = arith.constant 0.000000e+00 : f32
    %17 = vector.broadcast %cst_7 : f32 to vector<16x128xf32>
    %18 = arith.subf %17, %16 : vector<16x128xf32>
    %19 = math.exp %18 : vector<16x128xf32>
    %cst_8 = arith.constant 1.000000e+00 : f32
    %20 = vector.broadcast %cst_8 : f32 to vector<16x128xf32>
    %21 = arith.subf %20, %19 : vector<16x128xf32>
    %22 = arith.mulf %21, %21 : vector<16x128xf32>
    %cst_9 = arith.constant 1.000000e+00 : f32
    %23 = vector.broadcast %cst_9 : f32 to vector<16x128xf32>
    %24 = arith.mulf %23, %22 : vector<16x128xf32>
    %25 = arith.mulf %24, %16 : vector<16x128xf32>
    %26 = vector.shape_cast %25 : vector<16x128xf32> to vector<2x8x128xf32>
    %cst_10 = arith.constant dense<0.000000e+00> : vector<8x128xf32>
    %27 = vector.multi_reduction <add>, %26, %cst_10 [0] : vector<2x8x128xf32> to vector<8x128xf32>
    %c0_11 = arith.constant 0 : index
    %c0_12 = arith.constant 0 : index
    %28 = vector.load %arg3[%c0_11, %c0_12] : memref<8x128xf32, #tpu.memory_space<vmem>>, vector<8x128xf32>
    tpu.vector_store %arg3[%c0_11, %c0_12], %27 {strides = array<i32>} : memref<8x128xf32, #tpu.memory_space<vmem>>, vector<8x128xf32>,
    return
  }
  func.func @transform_0(%arg0: i32) -> (i32, i32) {
    %c0_i32 = arith.constant 0 : i32
    %c0_i32_0 = arith.constant 0 : i32
    return %arg0, %c0_i32 : i32, i32
  }
  func.func @transform_1(%arg0: i32) -> (i32, i32) {
    %c0_i32 = arith.constant 0 : i32
    %c0_i32_0 = arith.constant 0 : i32
    return %arg0, %c0_i32 : i32, i32
  }
  func.func @transform_2(%arg0: i32) -> (i32, i32) {
    %c0_i32 = arith.constant 0 : i32
    %c0_i32_0 = arith.constant 0 : i32
    return %arg0, %c0_i32 : i32, i32
  }
}

</mosaic_0001>

<bundles_post_ra>
// kernel: tpu_custom_call.1
= control target key start
LH: loop header
LB: loop body
LE: loop exit
PB: predicated region body
PF: predicated region fallthrough
CT: control target
= control target key end

     0   :  { %7 = vsyncpa [#allocation3], 0  ;;  %s243_s0 = inlined_call_operand.hbm [shape: f32[16,128], index: 0, kind: input, shape index: {}]   ;;  %s244_s1 = inlined_call_operand.hbm [shape: f32[16,128], index: 1, kind: input, shape index: {}]   ;;  %s245_s2 = inlined_call_operand.hbm [shape: f32[8,128], index: 2, kind: output, shape index: {}]  }
   0x1   :  { %8 = vsyncpa [#allocation6], 0 }
   0x2   :  { %9 = vsyncpa [#allocation4], 0  ;;  %s187_s9 = smov [#allocation2]   ;;  %s115_s13 = scalar_lea.hbm %s243_s0, 256 }
   0x3   :  { %s15_s10 = sshll.u32 %s187_s9, 4  ;;  %p116_p0 = scmp.ne.s32.totalorder %s243_s0, %s115_s13  ;;  %s16_s10 = int_to_ptr.vmem [resolvable:$true] %s15_s10 }
   0x4   :  { %p119_p1 = scmp.lt.u32.totalorder %s115_s13, %s243_s0 }
   0x6   :  { %p121_p2 = pnand %p119_p1, %p116_p0 }
   0x8   :  { %124 = shalt.err (!%p121_p2)
}
   0x9   :  { %s125_s18 = scalar_lea.vmem %s16_s10, 256  ;;  %p130_p4 = scmp.lt.s32.totalorder %s16_s10, %s16_s10 }
   0xa   :  { %p126_p3 = scmp.ne.s32.totalorder %s16_s10, %s125_s18  ;;  %p131_p5 = scmp.lt.s32.totalorder %s125_s18, %s125_s18 }
   0xc   :  { %p132_p6 = por %p131_p5, %p130_p4 }
   0xe   :  { %p133_p7 = pnand %p132_p6, %p126_p3 }
  0x10   :  { %136 = shalt.err (!%p133_p7)
}
  0x11   :  { %s188_s19 = smov 128   ;;  %s189_s20 = smov 8  }
  0x12   :  { %21 = dma.hbm_to_vmem [thread:$0]  %s243_s0, 256, %s16_s10, [#allocation3], %s188_s19, %s188_s19, %s189_s20  }
  0x13   :  { %s190_s23 = smov [#allocation5]   ;;  %s137_s27 = scalar_lea.hbm %s244_s1, 256 }
  0x14   :  { %s27_s24 = sshll.u32 %s190_s23, 4  ;;  %p138_p8 = scmp.ne.s32.totalorder %s244_s1, %s137_s27  ;;  %s28_s24 = int_to_ptr.vmem [resolvable:$true] %s27_s24 }
  0x15   :  { %p141_p9 = scmp.lt.u32.totalorder %s137_s27, %s244_s1 }
  0x17   :  { %p143_p10 = pnand %p141_p9, %p138_p8 }
  0x19   :  { %146 = shalt.err (!%p143_p10)
}
  0x1a   :  { %s147_s4 = scalar_lea.vmem %s28_s24, 256  ;;  %p152_p12 = scmp.lt.s32.totalorder %s28_s24, %s28_s24 }
  0x1b   :  { %p148_p11 = scmp.ne.s32.totalorder %s28_s24, %s147_s4  ;;  %p153_p13 = scmp.lt.s32.totalorder %s147_s4, %s147_s4 }
  0x1d   :  { %p154_p0 = por %p153_p13, %p152_p12 }
  0x1f   :  { %p155_p1 = pnand %p154_p0, %p148_p11 }
  0x21   :  { %158 = shalt.err (!%p155_p1)
}
  0x22   :  { %33 = dma.hbm_to_vmem [thread:$0]  %s244_s1, 256, %s28_s24, [#allocation6], %s188_s19, %s188_s19, %s189_s20  }
  0x23   :  { %181 = dma.done.wait [#allocation3], 256  }
  0x24   :  { %182 = vsyncadd [#allocation3], 4294967040 }
  0x25   :  { %183 = dma.done.wait [#allocation6], 256  }
  0x26   :  { %184 = vsyncadd [#allocation6], 4294967040  ;;  %v40_v0 = vld [vmem:[#allocation2] sm:$0xff]  ;;  %v41_v1 = vld [vmem:[#allocation2 + $0x8] sm:$0xff]  ;;  %s191_s1 = smov [#allocation7]  }
  0x27   :  { %103 = vlog2.f32 %v40_v0  ;;  %v50_v2 = vsub.f32 1.0, %v40_v0  ;;  %v51_v3 = vsub.f32 1.0, %v41_v1  ;;  %v42_v5 = vld [vmem:[#allocation5] sm:$0xff]  ;;  %v43_v7 = vld [vmem:[#allocation5 + $0x8] sm:$0xff]  ;;  %s88_s6 = sshll.u32 %s191_s1, 4  ;;  %s89_s6 = int_to_ptr.vmem [resolvable:$true] %s88_s6 }
  0x28   :  { %105 = vlog2.f32 %v41_v1  ;;  %v60_v14 = vsub.f32 1.0, %v42_v5  ;;  %v61_v17 = vsub.f32 1.0, %v43_v7  ;;  %s159_s7 = scalar_lea.vmem %s89_s6, 128  ;;  %p164_p3 = scmp.lt.s32.totalorder %s89_s6, %s89_s6 }
  0x29   :  { %107 = vlog2.f32 %v50_v2  ;;  %p160_p2 = scmp.ne.s32.totalorder %s89_s6, %s159_s7  ;;  %p165_p4 = scmp.lt.s32.totalorder %s159_s7, %s159_s7 }
  0x2a   :  { %109 = vlog2.f32 %v51_v3 }
  0x2b   :  { %p166_p5 = por %p165_p4, %p164_p3 }
  0x2d   :  { %p167_p6 = pnand %p166_p5, %p160_p2 }
  0x31   :  { %v104_v4 = vpop.eup %103 }
  0x32   :  { %v106_v6 = vpop.eup %105  ;;  %v45_v8 = vmul.f32 0.6931472, %v104_v4 }
  0x33   :  { %v108_v9 = vpop.eup %107  ;;  %v47_v10 = vmul.f32 0.6931472, %v106_v6 }
  0x34   :  { %v110_v11 = vpop.eup %109  ;;  %v48_v12 = vmax.f32 %v45_v8, -100.0  ;;  %v53_v13 = vmul.f32 0.6931472, %v108_v9 }
  0x35   :  { %v49_v15 = vmax.f32 %v47_v10, -100.0  ;;  %v55_v16 = vmul.f32 0.6931472, %v110_v11 }
  0x36   :  { %v56_v18 = vmax.f32 %v53_v13, -100.0  ;;  %v58_v19 = vmul.f32 %v48_v12, %v42_v5 }
  0x37   :  { %v57_v20 = vmax.f32 %v55_v16, -100.0  ;;  %v59_v21 = vmul.f32 %v49_v15, %v43_v7 }
  0x38   :  { %v62_v22 = vmul.f32 %v60_v14, %v56_v18 }
  0x39   :  { %v63_v23 = vmul.f32 %v61_v17, %v57_v20 }
  0x3a   :  { %v64_v24 = vadd.f32 %v62_v22, %v58_v19 }
  0x3b   :  { %v65_v25 = vadd.f32 %v63_v23, %v59_v21 }
  0x3c   :  { %v66_v26 = vsub.f32 0.0, %v64_v24 }
  0x3d   :  { %v67_v27 = vsub.f32 0.0, %v65_v25 }
  0x3e   :  { %v68_v28 = vsub.f32 0.0, %v66_v26 }
  0x3f   :  { %v69_v29 = vsub.f32 0.0, %v67_v27 }
  0x40   :  { %v70_v30 = vmul.f32 1.442695, %v68_v28 }
  0x41   :  { %v72_v31 = vmul.f32 1.442695, %v69_v29 }
  0x42   :  { %111 = vpow2.f32 %v70_v30 }
  0x43   :  { %113 = vpow2.f32 %v72_v31 }
  0x4c   :  { %v112_v32 = vpop.eup %111 }
  0x4d   :  { %v114_v33 = vpop.eup %113  ;;  %v74_v34 = vsub.f32 1.0, %v112_v32 }
  0x4e   :  { %v75_v35 = vsub.f32 1.0, %v114_v33 }
  0x4f   :  { %v76_v36 = vmul.f32 %v74_v34, %v74_v34 }
  0x50   :  { %v77_v37 = vmul.f32 %v75_v35, %v75_v35 }
  0x51   :  { %v78_v38 = vmul.f32 %v76_v36, %v66_v26 }
  0x52   :  { %v79_v39 = vmul.f32 %v77_v37, %v67_v27 }
  0x54   :  { %v80_v40 = vadd.f32 %v79_v39, %v78_v38 }
  0x56   :  { %81 = vst [vmem:[#allocation7] sm:$0xff] %v80_v40 }
  0x57   :  { %170 = shalt.err (!%p167_p6)
}
  0x58   :  { %s171_s10 = scalar_lea.hbm %s245_s2, 128 }
  0x59   :  { %p172_p7 = scmp.ne.s32.totalorder %s245_s2, %s171_s10  ;;  %p175_p8 = scmp.lt.u32.totalorder %s171_s10, %s245_s2 }
  0x5b   :  { %p177_p9 = pnand %p175_p8, %p172_p7 }
  0x5d   :  { %180 = shalt.err (!%p177_p9)
}
  0x5e   :  { %91 = dma.vmem_to_hbm [thread:$0]  %s89_s6, 128, %s245_s2, [#allocation4]  }
  0x5f   :  { %185 = dma.done.wait [#allocation4], 128  }
  0x60   :  { %186 = vsyncadd [#allocation4], 4294967168 }
  0x61   :  { %95 = vsyncpa [#allocation3], 1 }
  0x62   :  { %96 = vsyncpa [#allocation6], 1 }
  0x63   :  { %97 = vsyncpa [#allocation4], 1 }

</bundles_post_ra>
